<compile_context>
chip_gen: v6e
topology: v6e:2x2x1
jax: 0.10.0
libtpu: 0.0.40
codegen_flags: <defaults>
</compile_context>

<pallas_src>
import functools

import jax
import jax.numpy as jnp
from jax import lax
from jax.experimental import pallas as pl
from jax.experimental.pallas import tpu as pltpu

NUM_CLASSES = 400
BASE_WIDTH = 26            # res2net101_26w_4s: "26w"
SCALE = 4                  # res2net101_26w_4s: "4s"
EXPANSION = 4
LAYERS = (3, 4, 23, 3)     # res2net101 depth
STAGE_PLANES = (64, 128, 256, 512)
STAGE_STRIDES = (1, 2, 2, 2)

LANE = 128                          # channel padding target (TPU lane width)
TM = 256                            # row tile of the fused matmul kernel
TN_MAX = 512                        # output-channel tile of the fused matmul kernel
VMEM_LIMIT = 40 * 1024 * 1024       # explicit scoped-VMEM budget (fits v5e..v7x)
COLS_BUDGET = 4 * 1024 * 1024       # in-kernel im2col buffer budget (3x3 kernel)


def _round_up(x, m):
    return (x + m - 1) // m * m


# ----------------------- fused matmul + BN (+res) (+relu) --------------------

def _matmul_bn_kernel(x_ref, w_ref, s_ref, b_ref, o_ref, *, relu):
    acc = jnp.dot(x_ref[...], w_ref[...], preferred_element_type=jnp.float32)
    out = acc * s_ref[...] + b_ref[...]
    if relu:
        out = jnp.maximum(out, 0.0)
    o_ref[...] = out.astype(o_ref.dtype)


def _matmul_bn_res_kernel(x_ref, w_ref, s_ref, b_ref, r_ref, o_ref, *, relu):
    acc = jnp.dot(x_ref[...], w_ref[...], preferred_element_type=jnp.float32)
    out = acc * s_ref[...] + b_ref[...] + r_ref[...].astype(jnp.float32)
    if relu:
        out = jnp.maximum(out, 0.0)
    o_ref[...] = out.astype(o_ref.dtype)


@functools.partial(jax.jit, static_argnames=("relu", "out_dtype"))
def matmul_affine(x, w, scale, bias, residual=None, *, relu,
                  out_dtype=jnp.bfloat16):
    """out[m,n] = maybe_relu((x @ w)[m,n] * scale[n] + bias[n] (+ residual[m,n]))."""
    M, K = x.shape
    N = w.shape[1]

    # Keep the row (sublane) block dimension a multiple of 8.
    Mp = _round_up(max(M, 8), 8)
    if Mp != M:
        x = jnp.pad(x, ((0, Mp - M), (0, 0)))
        if residual is not None:
            residual = jnp.pad(residual, ((0, Mp - M), (0, 0)))

    tm = Mp if Mp <= TM else TM
    tn = N if N <= TN_MAX else TN_MAX
    # N on the outer grid axis: each weight slab is fetched once and streamed
    # against all row tiles; both axes are independent -> megacore-parallel.
    grid = (pl.cdiv(N, tn), pl.cdiv(Mp, tm))

    in_specs = [
        pl.BlockSpec((tm, K), lambda j, i: (i, 0)),
        pl.BlockSpec((K, tn), lambda j, i: (0, j)),
        pl.BlockSpec((1, tn), lambda j, i: (0, j)),
        pl.BlockSpec((1, tn), lambda j, i: (0, j)),
    ]
    args = [x, w, scale.reshape(1, N), bias.reshape(1, N)]
    if residual is None:
        kernel = functools.partial(_matmul_bn_kernel, relu=relu)
    else:
        kernel = functools.partial(_matmul_bn_res_kernel, relu=relu)
        in_specs.append(pl.BlockSpec((tm, tn), lambda j, i: (i, j)))
        args.append(residual)

    out_bytes = jnp.dtype(out_dtype).itemsize
    cost = pl.CostEstimate(
        flops=2 * Mp * K * N + 2 * Mp * N,
        transcendentals=0,
        bytes_accessed=int(2 * (Mp * K + K * N) + 8 * N + out_bytes * Mp * N
                           + (2 * Mp * N if residual is not None else 0)),
    )

    out = pl.pallas_call(
        kernel,
        out_shape=jax.ShapeDtypeStruct((Mp, N), out_dtype),
        grid=grid,
        in_specs=in_specs,
        out_specs=pl.BlockSpec((tm, tn), lambda j, i: (i, j)),
        compiler_params=pltpu.CompilerParams(
            dimension_semantics=("parallel", "parallel"),
            vmem_limit_bytes=VMEM_LIMIT),
        cost_estimate=cost,
    )(*args)
    return out[:M] if Mp != M else out


# ------------- stride-1 3x3 conv with in-kernel (VMEM) im2col ----------------

def _conv3x3_s1_kernel(x_hbm, w_ref, s_ref, b_ref, o_ref, xbuf, sem,
                       *, th, wo, cin):
    """One (image, row-tile) grid cell of a 3x3/s1/p1 conv + BN + ReLU.

    The haloed input row block is DMA'd from HBM once and the 9-tap im2col is
    assembled in VMEM -- no inflated im2col buffer ever touches HBM.
    """
    b = pl.program_id(0)
    t = pl.program_id(1)
    cp = pltpu.make_async_copy(x_hbm.at[b, pl.ds(t * th, th + 2)], xbuf, sem.at[0])
    cp.start()
    cp.wait()
    cols = jnp.concatenate(
        [xbuf[di:di + th, dj:dj + wo, :] for di in range(3) for dj in range(3)],
        axis=-1)                                        # (th, wo, 9*cin) in VMEM
    cols = cols.reshape(th * wo, 9 * cin)
    acc = jnp.dot(cols, w_ref[...], preferred_element_type=jnp.float32)
    out = jnp.maximum(acc * s_ref[...] + b_ref[...], 0.0)
    o_ref[...] = out.reshape(o_ref.shape).astype(o_ref.dtype)


def _pick_row_tile(h, w, cin):
    best = 1
    for th in range(1, h + 1):
        if h % th == 0 and th * w * 9 * cin * 2 <= COLS_BUDGET:
            best = th
    return best


@jax.jit
def conv3x3_s1_bn_relu(x, w9, scale, bias):
    """Fused 3x3/stride-1/pad-1 conv + folded BN + ReLU (NHWC, bf16)."""
    B, H, W, Cin = x.shape
    Cout = w9.shape[1]
    xp = jnp.pad(x, ((0, 0), (1, 1), (1, 1), (0, 0)))   # zero conv padding
    th = _pick_row_tile(H, W, Cin)
    kernel = functools.partial(_conv3x3_s1_kernel, th=th, wo=W, cin=Cin)
    cost = pl.CostEstimate(
        flops=2 * B * H * W * 9 * Cin * Cout,
        transcendentals=0,
        bytes_accessed=int(2 * (B * (H + 2) * (W + 2) * Cin + 9 * Cin * Cout
                                + B * H * W * Cout)),
    )
    return pl.pallas_call(
        kernel,
        out_shape=jax.ShapeDtypeStruct((B, H, W, Cout), jnp.bfloat16),
        grid=(B, H // th),
        in_specs=[
            pl.BlockSpec(memory_space=pl.ANY),                    # manual halo DMA
            pl.BlockSpec((9 * Cin, Cout), lambda b, t: (0, 0)),
            pl.BlockSpec((1, Cout), lambda b, t: (0, 0)),
            pl.BlockSpec((1, Cout), lambda b, t: (0, 0)),
        ],
        out_specs=pl.BlockSpec((1, th, W, Cout), lambda b, t: (b, t, 0, 0)),
        scratch_shapes=[
            pltpu.VMEM((th + 2, W + 2, Cin), jnp.bfloat16),
            pltpu.SemaphoreType.DMA((1,)),
        ],
        compiler_params=pltpu.CompilerParams(
            dimension_semantics=("parallel", "arbitrary"),
            vmem_limit_bytes=VMEM_LIMIT),
        cost_estimate=cost,
    )(xp, w9, scale.reshape(1, Cout), bias.reshape(1, Cout))


# --------------------------- conv / pooling wrappers --------------------------

@functools.partial(jax.jit, static_argnames=("stride", "relu"))
def conv1x1_bn_act(x, w, scale, bias, residual=None, *, stride=1, relu):
    """1x1 conv (matmul weight (Cin,Cout)) + BN affine + optional residual/ReLU."""
    if stride > 1:
        x = x[:, ::stride, ::stride, :]
    B, H, W, Cin = x.shape
    N = w.shape[1]
    r2 = None if residual is None else residual.reshape(-1, N)
    out = matmul_affine(x.reshape(B * H * W, Cin), w, scale, bias, r2, relu=relu)
    return out.reshape(B, H, W, N)


def _im2col(x, kh, kw, stride, padding):
    B, H, W, C = x.shape
    Ho = (H + 2 * padding - kh) // stride + 1
    Wo = (W + 2 * padding - kw) // stride + 1
    xp = jnp.pad(x, ((0, 0), (padding, padding), (padding, padding), (0, 0)))
    patches = [xp[:, i:i + stride * Ho:stride, j:j + stride * Wo:stride, :]
               for i in range(kh) for j in range(kw)]
    cols = jnp.concatenate(patches, axis=-1).reshape(B * Ho * Wo, kh * kw * C)
    return cols, Ho, Wo


@functools.partial(jax.jit, static_argnames=("kh", "kw", "stride", "padding", "relu"))
def conv_im2col_bn_act(x, w, scale, bias, *, kh, kw, stride, padding, relu):
    # Fallback path (stem 7x7/s2 and the few stride-2 3x3 branch convs):
    # XLA-side im2col feeding the fused Pallas matmul kernel.
    B = x.shape[0]
    N = w.shape[1]
    cols, Ho, Wo = _im2col(x, kh, kw, stride, padding)
    out = matmul_affine(cols, w, scale, bias, relu=relu)
    return out.reshape(B, Ho, Wo, N)


def conv3x3_bn_relu(x, w9, scale, bias, *, stride):
    if stride == 1:
        return conv3x3_s1_bn_relu(x, w9, scale, bias)
    return conv_im2col_bn_act(x, w9, scale, bias, kh=3, kw=3, stride=stride,
                              padding=1, relu=True)


def max_pool_3x3_s2(x):
    # PyTorch MaxPool2d(3, 2, 1) -- padding acts as -inf.
    neg_inf = jnp.asarray(-jnp.inf, dtype=x.dtype)
    return lax.reduce_window(x, neg_inf, lax.max, (1, 3, 3, 1), (1, 2, 2, 1),
                             [(0, 0), (1, 1), (1, 1), (0, 0)])


def avg_pool_3x3(x, stride):
    # PyTorch AvgPool2d(3, stride, padding=1), count_include_pad=True (default).
    s = lax.reduce_window(x.astype(jnp.float32), 0.0, lax.add, (1, 3, 3, 1),
                          (1, stride, stride, 1),
                          [(0, 0), (1, 1), (1, 1), (0, 0)])
    return (s / 9.0).astype(x.dtype)


# -------------------------------- parameters ----------------------------------

class ParamGen:
    """Deterministic synthetic parameter generator (no checkpoint loading)."""

    def __init__(self, seed=0):
        self.key = jax.random.PRNGKey(seed)
        self.count = 0

    def _next(self):
        self.count += 1
        return jax.random.fold_in(self.key, self.count)

    def conv(self, kh, kw, cin, cout):
        fan_in = kh * kw * cin
        return jax.random.normal(self._next(), (kh, kw, cin, cout),
                                 jnp.float32) * (2.0 / fan_in) ** 0.5

    def bn(self, c):
        # Eval-mode BN folded into per-channel scale/bias.
        gamma = 1.0 + 0.1 * jax.random.normal(self._next(), (c,), jnp.float32)
        beta = 0.1 * jax.random.normal(self._next(), (c,), jnp.float32)
        mean = 0.1 * jax.random.normal(self._next(), (c,), jnp.float32)
        var = jnp.abs(1.0 + 0.1 * jax.random.normal(self._next(), (c,), jnp.float32))
        scale = gamma / jnp.sqrt(var + 1e-5)
        bias = beta - mean * scale
        return scale, bias

    def linear(self, cin, cout):
        bound = 1.0 / (cin ** 0.5)
        w = jax.random.uniform(self._next(), (cin, cout), jnp.float32, -bound, bound)
        b = jax.random.uniform(self._next(), (cout,), jnp.float32, -bound, bound)
        return w, b


def _pad_branch_vec(v, width, wpad, n_branches):
    out = jnp.zeros((n_branches * wpad,), jnp.float32)
    for i in range(n_branches):
        out = out.at[i * wpad:i * wpad + width].set(v[i * width:(i + 1) * width])
    return out


def make_bottle2neck_params(gen, inplanes, planes, stride, has_downsample):
    width = (planes * BASE_WIDTH) // 64
    wpad = _round_up(width, LANE)          # lane-dense branch width (128/256)
    outplanes = planes * EXPANSION

    # conv1 (1x1): branch i's real outputs live at lane-aligned offset i*wpad;
    # padded columns have zero weight and zero BN scale/bias so they stay 0.
    w1 = gen.conv(1, 1, inplanes, width * SCALE).reshape(inplanes, width * SCALE)
    s1, b1 = gen.bn(width * SCALE)
    w1p = jnp.zeros((inplanes, SCALE * wpad), jnp.float32)
    for i in range(SCALE):
        w1p = w1p.at[:, i * wpad:i * wpad + width].set(
            w1[:, i * width:(i + 1) * width])
    bn1 = (_pad_branch_vec(s1, width, wpad, SCALE),
           _pad_branch_vec(b1, width, wpad, SCALE))

    # branch 3x3 convs, stored zero-padded in (9*wpad, wpad) matmul form.
    convs, bns = [], []
    for _ in range(SCALE - 1):
        wc = gen.conv(3, 3, width, width)
        wcp = jnp.zeros((3, 3, wpad, wpad), jnp.float32)
        wcp = wcp.at[:, :, :width, :width].set(wc)
        convs.append(wcp.reshape(9 * wpad, wpad).astype(jnp.bfloat16))
        sc, bc = gen.bn(width)
        bns.append((jnp.zeros((wpad,), jnp.float32).at[:width].set(sc),
                    jnp.zeros((wpad,), jnp.float32).at[:width].set(bc)))

    # conv3 (1x1) consumes the padded concat: zero rows at padded channels.
    w3 = gen.conv(1, 1, width * SCALE, outplanes).reshape(width * SCALE, outplanes)
    w3p = jnp.zeros((SCALE * wpad, outplanes), jnp.float32)
    for i in range(SCALE):
        w3p = w3p.at[i * wpad:i * wpad + width, :].set(
            w3[i * width:(i + 1) * width, :])

    p = {
        "width": width, "wpad": wpad, "stride": stride,
        "is_first": stride > 1 or has_downsample,
        "conv1_w": w1p.astype(jnp.bfloat16), "bn1": bn1,
        "convs": convs, "bns": bns,
        "conv3_w": w3p.astype(jnp.bfloat16), "bn3": gen.bn(outplanes),
    }
    if has_downsample:
        p["down_w"] = gen.conv(1, 1, inplanes, outplanes).reshape(
            inplanes, outplanes).astype(jnp.bfloat16)
        p["down_bn"] = gen.bn(outplanes)
    return p


def make_params():
    gen = ParamGen(0)
    ncls_pad = _round_up(NUM_CLASSES, LANE)          # 400 -> 512 (lane-dense head)
    params = {
        "stem_w": gen.conv(7, 7, 3, 64).reshape(7 * 7 * 3, 64).astype(jnp.bfloat16),
        "stem_bn": gen.bn(64),
    }
    inplanes = 64
    stages = []
    for planes, nblocks, stride in zip(STAGE_PLANES, LAYERS, STAGE_STRIDES):
        blocks = []
        for bi in range(nblocks):
            s = stride if bi == 0 else 1
            has_down = (bi == 0) and (s != 1 or inplanes != planes * EXPANSION)
            blocks.append(make_bottle2neck_params(gen, inplanes, planes, s, has_down))
            inplanes = planes * EXPANSION
        stages.append(blocks)
    params["stages"] = stages
    w_fc, b_fc = gen.linear(512 * EXPANSION, NUM_CLASSES)
    params["fc"] = (
        jnp.zeros((512 * EXPANSION, ncls_pad), jnp.float32)
        .at[:, :NUM_CLASSES].set(w_fc).astype(jnp.bfloat16),
        jnp.zeros((ncls_pad,), jnp.float32).at[:NUM_CLASSES].set(b_fc),
    )
    return params


# -------------------------------- forward pass --------------------------------

def bottle2neck_forward(x, p):
    wpad, stride, is_first = p["wpad"], p["stride"], p["is_first"]

    s1, b1 = p["bn1"]
    out = conv1x1_bn_act(x, p["conv1_w"], s1, b1, relu=True)      # (B,H,W,SCALE*wpad)

    spx = [out[..., i * wpad:(i + 1) * wpad] for i in range(SCALE)]
    spo = []
    sp = None
    for i in range(SCALE - 1):
        sp = spx[i] if (i == 0 or is_first) else sp + spx[i]
        si, bi_ = p["bns"][i]
        sp = conv3x3_bn_relu(sp, p["convs"][i], si, bi_, stride=stride)
        spo.append(sp)
    # last scale branch: identity (or 3x3 avg-pool in the "first" block of a stage)
    spo.append(avg_pool_3x3(spx[-1], stride) if is_first else spx[-1])
    cat = jnp.concatenate(spo, axis=-1)                            # (B,Ho,Wo,SCALE*wpad)

    if "down_w" in p:
        ds_, db_ = p["down_bn"]
        shortcut = conv1x1_bn_act(x, p["down_w"], ds_, db_, stride=stride, relu=False)
    else:
        shortcut = x

    s3, b3 = p["bn3"]
    # conv3 + BN + residual add + ReLU fused into one Pallas matmul kernel.
    return conv1x1_bn_act(cat, p["conv3_w"], s3, b3, residual=shortcut, relu=True)


def res2net_forward(x_nchw, params):
    # PyTorch feeds NCHW; internal compute is channel-last bf16 (channels = lanes).
    x = jnp.transpose(x_nchw, (0, 2, 3, 1)).astype(jnp.bfloat16)

    ss, sb = params["stem_bn"]
    x = conv_im2col_bn_act(x, params["stem_w"], ss, sb, kh=7, kw=7, stride=2,
                           padding=3, relu=True)
    x = max_pool_3x3_s2(x)

    for blocks in params["stages"]:
        for p in blocks:
            x = bottle2neck_forward(x, p)

    x = jnp.mean(x.astype(jnp.float32), axis=(1, 2))               # [B, 2048]
    w_fc, b_fc = params["fc"]
    n_pad = w_fc.shape[1]
    logits = matmul_affine(x.astype(jnp.bfloat16), w_fc,
                           jnp.ones((n_pad,), jnp.float32), b_fc,
                           relu=False, out_dtype=jnp.float32)
    return logits[:, :NUM_CLASSES]                                  # [B, NUM_CLASSES]


# ----------------------------------- main --------------------------------------

if __name__ == "__main__":
    params = make_params()
    key = jax.random.PRNGKey(0)
    # Small NCHW image batch, consistent with the PyTorch forward (3-channel images).
    x = jax.random.normal(key, (2, 3, 32, 32), dtype=jnp.float32)
    logits = res2net_forward(x, params)
    logits = jax.block_until_ready(logits)
    assert logits.shape == (2, NUM_CLASSES)
    assert bool(jnp.all(jnp.isfinite(logits)))
    print("KERNEL_OK")
</pallas_src>

<mosaic_0001>
module attributes {stable_mosaic.version = 11 : i64} {
  func.func @_matmul_bn_kernel(%arg0: i32, %arg1: i32, %arg2: memref<256x147xbf16, #tpu.memory_space<vmem>>, %arg3: memref<147x64xbf16, #tpu.memory_space<vmem>>, %arg4: memref<1x64xf32, #tpu.memory_space<vmem>>, %arg5: memref<1x64xf32, #tpu.memory_space<vmem>>, %arg6: memref<256x64xbf16, #tpu.memory_space<vmem>>) attributes {dimension_semantics = [#tpu.dimension_semantics<parallel>, #tpu.dimension_semantics<parallel>], iteration_bounds = array<i64: 1, 2>, scalar_prefetch = 0 : i64, scratch_operands = 0 : i64, tpu.core_type = #tpu.core_type<tc>, window_params = [{transform_indices = @transform_0, window_bounds = array<i64: 256, 147>}, {transform_indices = @transform_1, window_bounds = array<i64: 147, 64>}, {transform_indices = @transform_2, window_bounds = array<i64: 1, 64>}, {transform_indices = @transform_3, window_bounds = array<i64: 1, 64>}, {transform_indices = @transform_4, window_bounds = array<i64: 256, 64>}]} {
    %c0 = arith.constant 0 : index
    %c0_0 = arith.constant 0 : index
    %0 = vector.load %arg2[%c0, %c0_0] : memref<256x147xbf16, #tpu.memory_space<vmem>>, vector<256x147xbf16>
    %c0_1 = arith.constant 0 : index
    %c0_2 = arith.constant 0 : index
    %1 = vector.load %arg3[%c0_1, %c0_2] : memref<147x64xbf16, #tpu.memory_space<vmem>>, vector<147x64xbf16>
    %cst = arith.constant dense<0.000000e+00> : vector<256x64xf32>
    %2 = tpu.matmul %0, %1, %cst {dimension_numbers = #tpu.dot_dimension_numbers<[1], [0], [0], [1], [0, 0, 1, 1], [], []>} : vector<256x147xbf16>, vector<147x64xbf16>, vector<256x64xf32> -> vector<256x64xf32>
    %c0_3 = arith.constant 0 : index
    %c0_4 = arith.constant 0 : index
    %3 = vector.load %arg4[%c0_3, %c0_4] : memref<1x64xf32, #tpu.memory_space<vmem>>, vector<1x64xf32>
    %4 = vector.broadcast %3 : vector<1x64xf32> to vector<256x64xf32>
    %5 = arith.mulf %2, %4 : vector<256x64xf32>
    %c0_5 = arith.constant 0 : index
    %c0_6 = arith.constant 0 : index
    %6 = vector.load %arg5[%c0_5, %c0_6] : memref<1x64xf32, #tpu.memory_space<vmem>>, vector<1x64xf32>
    %7 = vector.broadcast %6 : vector<1x64xf32> to vector<256x64xf32>
    %8 = arith.addf %5, %7 : vector<256x64xf32>
    %cst_7 = arith.constant 0.000000e+00 : f32
    %9 = vector.broadcast %cst_7 : f32 to vector<256x64xf32>
    %10 = arith.maximumf %8, %9 : vector<256x64xf32>
    %11 = arith.truncf %10 : vector<256x64xf32> to vector<256x64xbf16>
    %c0_8 = arith.constant 0 : index
    %c0_9 = arith.constant 0 : index
    %12 = vector.load %arg6[%c0_8, %c0_9] : memref<256x64xbf16, #tpu.memory_space<vmem>>, vector<256x64xbf16>
    tpu.vector_store %arg6[%c0_8, %c0_9], %11 {strides = array<i32>} : memref<256x64xbf16, #tpu.memory_space<vmem>>, vector<256x64xbf16>,
    return
  }
  func.func @transform_0(%arg0: i32, %arg1: i32) -> (i32, i32) {
    %c0_i32 = arith.constant 0 : i32
    %c0_i32_0 = arith.constant 0 : i32
    return %arg1, %c0_i32 : i32, i32
  }
  func.func @transform_1(%arg0: i32, %arg1: i32) -> (i32, i32) {
    %c0_i32 = arith.constant 0 : i32
    %c0_i32_0 = arith.constant 0 : i32
    return %c0_i32, %arg0 : i32, i32
  }
  func.func @transform_2(%arg0: i32, %arg1: i32) -> (i32, i32) {
    %c0_i32 = arith.constant 0 : i32
    %c0_i32_0 = arith.constant 0 : i32
    return %c0_i32, %arg0 : i32, i32
  }
  func.func @transform_3(%arg0: i32, %arg1: i32) -> (i32, i32) {
    %c0_i32 = arith.constant 0 : i32
    %c0_i32_0 = arith.constant 0 : i32
    return %c0_i32, %arg0 : i32, i32
  }
  func.func @transform_4(%arg0: i32, %arg1: i32) -> (i32, i32) {
    %c0_i32 = arith.constant 0 : i32
    return %arg1, %arg0 : i32, i32
  }
}

</mosaic_0001>

<bundles_post_ra>
// kernel: matmul_affine.1
= control target key start
LH: loop header
LB: loop body
LE: loop exit
PB: predicated region body
PF: predicated region fallthrough
CT: control target
= control target key end

     0   :  { %s1419_s15 = smov 0   ;;  %s1421_s16 = smov 0   ;;  %s1676_s0 = inlined_call_operand.vmem [shape: bf16[512,147], index: 0, kind: input, shape index: {}]   ;;  %s1677_s1 = inlined_call_operand.vmem [shape: bf16[147,64], index: 1, kind: input, shape index: {}]   ;;  %s1678_s2 = inlined_call_operand.vmem [shape: f32[1,64], index: 2, kind: input, shape index: {}]   ;;  %s1679_s3 = inlined_call_operand.vmem [shape: f32[1,64], index: 3, kind: input, shape index: {}]   ;;  %s1680_s4 = inlined_call_operand.vmem [shape: bf16[512,64], index: 4, kind: output, shape index: {}]  }
   0x1   :  { %s1423_s17 = smov 0  }
   0x2 LB: > { %s23_s18 = sadd.s32 1, %s1386_s16  ;;  %p1131_p0 = scmp.ge.s32.totalorder %s1390_s17, 1  ;;  %s1390_s17 = sphi %s1423_s17, %s14_s17   ;;  %s1386_s16 = sphi %s1421_s16, %s1682_s16   ;;  %s1382_s15 = sphi %s1419_s15, %s1681_s15  }
   0x3   : > { %p24_p1 = scmp.ge.s32.totalorder %s23_s18, 2  ;;  %p203_p2 = scmp.lt.s32.totalorder %s1390_s17, 3 }
   0x5   : > { %s1684_s18 = smov (%p24_p1, %s23_s18), 0  ;;  %p204_p3 = pnand %p1131_p0, %p203_p2 }
   0x6   : > { %s1132_s25 = sshll.u32 (!%p204_p3), %s1382_s15, 5 }
   0x7   : > { %207 = sbr.rel (%p204_p3) target bundleno = 315 (0x13b), region = 36  ;;  %p244_p4 = scmp.lt.s32.totalorder (!%p204_p3), %s1132_s25, 63 }
   0xc   : > { %v1310_v0 = vld [vmem:[%s1677_s1 + $0x38] sm:$0xff]   ;;  %v1392_v1 = vmov 0   ;;  %v1311_v2 = vld [vmem:[%s1677_s1 + $0x30] sm:$0xff]   ;;  %v1312_v3 = vld [vmem:[%s1677_s1 + $0x28] sm:$0xff]   ;;  %s1686_s25 = smov (!%p244_p4, %s1132_s25), 63  ;;  %vm522_vm0 = vcmask 154624  }
   0xd   : > { %578 = vmatprep.subr.bf16.mxu0 %v1392_v1  ;;  %1264 = vmatprep.subr.bf16.mxu1 %v1392_v1  ;;  %v1313_v4 = vld [vmem:[%s1677_s1 + $0x20] sm:$0xff]   ;;  %s1231_s28 = sshll.u32 %s1686_s25, 3  ;;  %v1314_v5 = vld [vmem:[%s1677_s1 + $0x18] sm:$0xff]   ;;  %v1315_v8 = vld [vmem:[%s1677_s1 + $0x10] sm:$0xff]   ;;  %vm571_vm1 = vcmask 1040384   ;;  %vm572_vm2 = vcmask 1041408  }
   0xe   : > { %579 = vmatpush1.bf16.msra.mxu0 %v1310_v0  ;;  %1274 = vmatpush1.bf16.msra.mxu1 %v1310_v0  ;;  %s1455_s5 = scalar_lea.vmem %s1676_s0, %s1231_s28  ;;  %v1316_v9 = vld [vmem:[%s1677_s1 + $0x8] sm:$0xff]   ;;  %v1393_v10 = vmov 65535   ;;  %v1317_v12 = vld [vmem:[%s1677_s1] sm:$0xff]   ;;  %s1136_s26 = sshll.u32 %s1686_s25, 2  ;;  %vm977_vm3 = vcmask 519168  }
   0xf   : > { %580 = vmatprep.subr.bf16.mxu0 %v1392_v1  ;;  %1265 = vmatprep.subr.bf16.mxu1 %v1392_v1  ;;  %v1322_v6 = vld [vmem:[%s1455_s5 + $0x4] ss:$8 sps:$4 sm:$0xff]   ;;  %v573_v11 = vsel %vm571_vm1, 4294967295, %v1393_v10  ;;  %v1318_v13 = vld [vmem:[%s1677_s1 + $0x48] ss:$0 sps:$4 sm:$0x33]   ;;  %s1543_s29 = scalar_lea.vmem %s1680_s4, %s1136_s26 }
  0x10   : > { %v1325_v7 = vld [vmem:[%s1455_s5 + $0x84] ss:$8 sps:$4 sm:$0xff]   ;;  %1179 = vmatprep.mubr.msk.bf16.mxu0 %vm522_vm0, %v1322_v6  ;;  %v574_v14 = vsel %vm572_vm2, %v573_v11, 0  ;;  %v1320_v17 = vld [vmem:[%s1455_s5] ss:$8 sps:$4 sm:$0xff]  }
  0x11   : > { %1187 = vmatprep.mubr.msk.bf16.mxu1 %vm522_vm0, %v1325_v7  ;;  %v576_v15 = vand.u32 %v1318_v13, %v574_v14  ;;  %v1319_v16 = vld [vmem:[%s1677_s1 + $0x40] sm:$0xff]   ;;  %v1326_v19 = vld [vmem:[%s1455_s5 + $0x14] ss:$8 sps:$4 sm:$0xff]   ;;  %v1330_v21 = vld [vmem:[%s1455_s5 + $0x10] ss:$8 sps:$4 sm:$0xff]  }
  0x12   : > { %581 = vmatpush1.bf16.msra.mxu0 %v1311_v2  ;;  %1275 = vmatpush1.bf16.msra.mxu1 %v1311_v2  ;;  %v1323_v18 = vld [vmem:[%s1455_s5 + $0x80] ss:$8 sps:$4 sm:$0xff]   ;;  %v1328_v20 = vld [vmem:[%s1455_s5 + $0x94] ss:$8 sps:$4 sm:$0xff]   ;;  %v1331_v22 = vld [vmem:[%s1455_s5 + $0x90] ss:$8 sps:$4 sm:$0xff]  }
  0x13   : > { %582 = vmatprep.subr.bf16.mxu0 %v1392_v1  ;;  %1266 = vmatprep.subr.bf16.mxu1 %v1392_v1  ;;  %v1332_v23 = vld [vmem:[%s1455_s5 + $0x24] ss:$8 sps:$4 sm:$0xff]   ;;  %v1336_v25 = vld [vmem:[%s1455_s5 + $0x20] ss:$8 sps:$4 sm:$0xff]   ;;  %v1338_v27 = vld [vmem:[%s1455_s5 + $0x34] ss:$8 sps:$4 sm:$0xff]  }
  0x14   : > { %v1334_v24 = vld [vmem:[%s1455_s5 + $0xa4] ss:$8 sps:$4 sm:$0xff]   ;;  %v1337_v26 = vld [vmem:[%s1455_s5 + $0xa0] ss:$8 sps:$4 sm:$0xff]   ;;  %v1340_v28 = vld [vmem:[%s1455_s5 + $0xb4] ss:$8 sps:$4 sm:$0xff]  }
  0x15   : > { %v1342_v29 = vld [vmem:[%s1455_s5 + $0x30] ss:$8 sps:$4 sm:$0xff]   ;;  %v1344_v31 = vld [vmem:[%s1455_s5 + $0x44] ss:$8 sps:$4 sm:$0xff]   ;;  %v1348_v33 = vld [vmem:[%s1455_s5 + $0x40] ss:$8 sps:$4 sm:$0xff]  }
  0x16   : > { %583 = vmatpush1.bf16.msra.mxu0 %v1312_v3  ;;  %1276 = vmatpush1.bf16.msra.mxu1 %v1312_v3  ;;  %v1343_v30 = vld [vmem:[%s1455_s5 + $0xb0] ss:$8 sps:$4 sm:$0xff]   ;;  %v1346_v32 = vld [vmem:[%s1455_s5 + $0xc4] ss:$8 sps:$4 sm:$0xff]   ;;  %v1349_v34 = vld [vmem:[%s1455_s5 + $0xc0] ss:$8 sps:$4 sm:$0xff]  }
  0x17   : > { %584 = vmatprep.subr.bf16.mxu0 %v1392_v1  ;;  %1267 = vmatprep.subr.bf16.mxu1 %v1392_v1  ;;  %v1350_v35 = vld [vmem:[%s1455_s5 + $0x54] ss:$8 sps:$4 sm:$0xff]   ;;  %v1354_v37 = vld [vmem:[%s1455_s5 + $0x50] ss:$8 sps:$4 sm:$0xff]   ;;  %v1356_v39 = vld [vmem:[%s1455_s5 + $0x64] ss:$8 sps:$4 sm:$0xff]  }
  0x18   : > { %v1352_v36 = vld [vmem:[%s1455_s5 + $0xd4] ss:$8 sps:$4 sm:$0xff]   ;;  %v1355_v38 = vld [vmem:[%s1455_s5 + $0xd0] ss:$8 sps:$4 sm:$0xff]   ;;  %v1358_v40 = vld [vmem:[%s1455_s5 + $0xe4] ss:$8 sps:$4 sm:$0xff]  }
  0x19   : > { %v1360_v41 = vld [vmem:[%s1455_s5 + $0x60] ss:$8 sps:$4 sm:$0xff]   ;;  %v1362_v43 = vld [vmem:[%s1455_s5 + $0x74] ss:$8 sps:$4 sm:$0xff]   ;;  %v1366_v45 = vld [vmem:[%s1455_s5 + $0x70] ss:$8 sps:$4 sm:$0xff]  }
  0x1a   : > { %585 = vmatpush1.bf16.msra.mxu0 %v1313_v4  ;;  %1277 = vmatpush1.bf16.msra.mxu1 %v1313_v4  ;;  %v1361_v42 = vld [vmem:[%s1455_s5 + $0xe0] ss:$8 sps:$4 sm:$0xff]   ;;  %v1364_v44 = vld [vmem:[%s1455_s5 + $0xf4] ss:$8 sps:$4 sm:$0xff]   ;;  %v1367_v46 = vld [vmem:[%s1455_s5 + $0xf0] ss:$8 sps:$4 sm:$0xff]  }
  0x1b   : > { %586 = vmatprep.subr.bf16.mxu0 %v1392_v1  ;;  %1268 = vmatprep.subr.bf16.mxu1 %v1392_v1  ;;  %v1526_v47 = vld [vmem:[%s1678_s2] ss:$0 sm:$0xff] }
  0x1c   : > { %v1531_v49 = vld [vmem:[%s1679_s3] ss:$0 sm:$0xff] }
  0x1e   : > { %587 = vmatpush1.bf16.msra.mxu0 %v1314_v5  ;;  %1278 = vmatpush1.bf16.msra.mxu1 %v1314_v5 }
  0x1f   : > { %588 = vmatprep.subr.bf16.mxu0 %v1392_v1  ;;  %1269 = vmatprep.subr.bf16.mxu1 %v1392_v1 }
  0x22   : > { %589 = vmatpush1.bf16.msra.mxu0 %v1315_v8  ;;  %1279 = vmatpush1.bf16.msra.mxu1 %v1315_v8 }
  0x23   : > { %590 = vmatprep.subr.bf16.mxu0 %v1392_v1  ;;  %1270 = vmatprep.subr.bf16.mxu1 %v1392_v1 }
  0x26   : > { %591 = vmatpush1.bf16.msra.mxu0 %v1316_v9  ;;  %1280 = vmatpush1.bf16.msra.mxu1 %v1316_v9 }
  0x27   : > { %592 = vmatprep.subr.bf16.mxu0 %v1392_v1  ;;  %1271 = vmatprep.subr.bf16.mxu1 %v1392_v1 }
  0x2a   : > { %593 = vmatpush1.bf16.msra.mxu0 %v1317_v12  ;;  %1281 = vmatpush1.bf16.msra.mxu1 %v1317_v12 }
  0x2b   : > { %606 = vmatprep.subr.bf16.mxu0 %v1392_v1  ;;  %1272 = vmatprep.subr.bf16.mxu1 %v1392_v1 }
  0x2e   : > { %607 = vmatpush2.bf16.msra.mxu0 %v576_v15  ;;  %1282 = vmatpush2.bf16.msra.mxu1 %v576_v15 }
  0x2f   : > { %608 = vmatprep.subr.bf16.mxu0 %v1392_v1  ;;  %1273 = vmatprep.subr.bf16.mxu1 %v1392_v1 }
  0x32   : > { %609 = vmatpush2.bf16.msra.mxu0 %v1319_v16  ;;  %1283 = vmatpush2.bf16.msra.mxu1 %v1319_v16 }
  0x35   : > { %611 = vmatmul.mubr.bf16.vlgmr.msra.gmra.mxu0 %v1320_v17  ;;  %675 = vmatmul.mubr.bf16.vlgmr.msra.gmra.mxu1 %v1323_v18 }
  0x36   : > { %1180 = vmatprep.mubr.msk.bf16.mxu0 %vm522_vm0, %v1326_v19  ;;  %1188 = vmatprep.mubr.msk.bf16.mxu1 %vm522_vm0, %v1328_v20 }
  0x3d   : > { %619 = vmatmul.mubr.bf16.gmra.mxu0 %v1330_v21  ;;  %683 = vmatmul.mubr.bf16.gmra.mxu1 %v1331_v22 }
  0x3e   : > { %1181 = vmatprep.mubr.msk.bf16.mxu0 %vm522_vm0, %v1332_v23  ;;  %1189 = vmatprep.mubr.msk.bf16.mxu1 %vm522_vm0, %v1334_v24 }
  0x45   : > { %627 = vmatmul.mubr.bf16.gmra.mxu0 %v1336_v25  ;;  %691 = vmatmul.mubr.bf16.gmra.mxu1 %v1337_v26 }
  0x46   : > { %1182 = vmatprep.mubr.msk.bf16.mxu0 %vm522_vm0, %v1338_v27  ;;  %1190 = vmatprep.mubr.msk.bf16.mxu1 %vm522_vm0, %v1340_v28 }
  0x4d   : > { %635 = vmatmul.mubr.bf16.gmra.mxu0 %v1342_v29  ;;  %699 = vmatmul.mubr.bf16.gmra.mxu1 %v1343_v30 }
  0x4e   : > { %1183 = vmatprep.mubr.msk.bf16.mxu0 %vm522_vm0, %v1344_v31  ;;  %1191 = vmatprep.mubr.msk.bf16.mxu1 %vm522_vm0, %v1346_v32 }
  0x55   : > { %643 = vmatmul.mubr.bf16.gmra.mxu0 %v1348_v33  ;;  %707 = vmatmul.mubr.bf16.gmra.mxu1 %v1349_v34 }
  0x56   : > { %1184 = vmatprep.mubr.msk.bf16.mxu0 %vm522_vm0, %v1350_v35  ;;  %1192 = vmatprep.mubr.msk.bf16.mxu1 %vm522_vm0, %v1352_v36 }
  0x5d   : > { %651 = vmatmul.mubr.bf16.gmra.mxu0 %v1354_v37  ;;  %715 = vmatmul.mubr.bf16.gmra.mxu1 %v1355_v38 }
  0x5e   : > { %1185 = vmatprep.mubr.msk.bf16.mxu0 %vm522_vm0, %v1356_v39  ;;  %1193 = vmatprep.mubr.msk.bf16.mxu1 %vm522_vm0, %v1358_v40 }
  0x65   : > { %659 = vmatmul.mubr.bf16.gmra.mxu0 %v1360_v41  ;;  %723 = vmatmul.mubr.bf16.gmra.mxu1 %v1361_v42 }
  0x66   : > { %1186 = vmatprep.mubr.msk.bf16.mxu0 %vm522_vm0, %v1362_v43  ;;  %1194 = vmatprep.mubr.msk.bf16.mxu1 %vm522_vm0, %v1364_v44 }
  0x6d   : > { %667 = vmatmul.mubr.bf16.gmra.mxu0 %v1366_v45  ;;  %731 = vmatmul.mubr.bf16.gmra.mxu1 %v1367_v46 }
  0xf5   : > { %v612_v48 = vpop.f32.mrf.mxu0  ;;  %v676_v50 = vpop.f32.mrf.mxu1 }
  0xf6   : > { %v746_v51 = vmul.f32 %v1526_v47, %v612_v48  ;;  %v762_v52 = vmul.f32 %v1526_v47, %v676_v50 }
  0xf7   : > { %v614_v53 = vpop.f32.mrf.mxu0  ;;  %v678_v54 = vpop.f32.mrf.mxu1 }
  0xf8   : > { %v785_v55 = vadd.f32 %v1531_v49, %v746_v51  ;;  %v801_v56 = vadd.f32 %v1531_v49, %v762_v52 }
  0xf9   : > { %v615_v57 = vpop.f32.mrf.mxu0  ;;  %v679_v58 = vpop.f32.mrf.mxu1 }
  0xfa   : > { %v817_v59 = vmax.f32 %v785_v55, 0.0  ;;  %v833_v60 = vmax.f32 %v801_v56, 0.0  ;;  %v747_v61 = vmul.f32 %v1526_v47, %v615_v57  ;;  %v763_v62 = vmul.f32 %v1526_v47, %v679_v58 }
  0xfb   : > { %v617_v63 = vpop.f32.mrf.mxu0  ;;  %v681_v0 = vpop.f32.mrf.mxu1 }
  0xfc   : > { %v1232_v1 = vpack.c.bf16 %v817_v59, %v817_v59  ;;  %v1248_v2 = vpack.c.bf16 %v833_v60, %v833_v60  ;;  %v786_v3 = vadd.f32 %v1531_v49, %v747_v61  ;;  %v802_v4 = vadd.f32 %v1531_v49, %v763_v62 }
  0xfd   : > { %v620_v5 = vpop.f32.mrf.mxu0  ;;  %v684_v6 = vpop.f32.mrf.mxu1 }
  0xfe   : > { %978 = vst.msk [vmem:[%s1543_s29] sm:$0xf] %vm977_vm3, %v1232_v1  ;;  %994 = vst.msk [vmem:[%s1543_s29 + $0x40] sm:$0xf] %vm977_vm3, %v1248_v2  ;;  %v818_v7 = vmax.f32 %v786_v3, 0.0  ;;  %v834_v8 = vmax.f32 %v802_v4, 0.0  ;;  %v748_v9 = vmul.f32 %v1526_v47, %v620_v5  ;;  %v764_v10 = vmul.f32 %v1526_v47, %v684_v6 }
  0xff   : > { %v622_v11 = vpop.f32.mrf.mxu0  ;;  %v686_v12 = vpop.f32.mrf.mxu1 }
 0x100   : > { %v1233_v13 = vpack.c.bf16 %v818_v7, %v818_v7  ;;  %v1249_v14 = vpack.c.bf16 %v834_v8, %v834_v8  ;;  %v787_v15 = vadd.f32 %v1531_v49, %v748_v9  ;;  %v803_v16 = vadd.f32 %v1531_v49, %v764_v10 }
 0x101   : > { %v623_v17 = vpop.f32.mrf.mxu0  ;;  %v687_v18 = vpop.f32.mrf.mxu1 }
 0x102   : > { %979 = vst.msk [vmem:[%s1543_s29 + $0x4] sm:$0xf] %vm977_vm3, %v1233_v13  ;;  %995 = vst.msk [vmem:[%s1543_s29 + $0x44] sm:$0xf] %vm977_vm3, %v1249_v14  ;;  %v819_v19 = vmax.f32 %v787_v15, 0.0  ;;  %v835_v20 = vmax.f32 %v803_v16, 0.0  ;;  %v749_v21 = vmul.f32 %v1526_v47, %v623_v17  ;;  %v765_v22 = vmul.f32 %v1526_v47, %v687_v18 }
 0x103   : > { %v625_v23 = vpop.f32.mrf.mxu0  ;;  %v689_v24 = vpop.f32.mrf.mxu1 }
 0x104   : > { %v1234_v25 = vpack.c.bf16 %v819_v19, %v819_v19  ;;  %v1250_v26 = vpack.c.bf16 %v835_v20, %v835_v20  ;;  %v788_v27 = vadd.f32 %v1531_v49, %v749_v21  ;;  %v804_v28 = vadd.f32 %v1531_v49, %v765_v22 }
 0x105   : > { %v628_v29 = vpop.f32.mrf.mxu0  ;;  %v692_v30 = vpop.f32.mrf.mxu1 }
 0x106   : > { %980 = vst.msk [vmem:[%s1543_s29 + $0x8] sm:$0xf] %vm977_vm3, %v1234_v25  ;;  %996 = vst.msk [vmem:[%s1543_s29 + $0x48] sm:$0xf] %vm977_vm3, %v1250_v26  ;;  %v820_v31 = vmax.f32 %v788_v27, 0.0  ;;  %v836_v32 = vmax.f32 %v804_v28, 0.0  ;;  %v750_v33 = vmul.f32 %v1526_v47, %v628_v29  ;;  %v766_v34 = vmul.f32 %v1526_v47, %v692_v30 }
 0x107   : > { %v630_v35 = vpop.f32.mrf.mxu0  ;;  %v694_v36 = vpop.f32.mrf.mxu1 }
 0x108   : > { %v1235_v37 = vpack.c.bf16 %v820_v31, %v820_v31  ;;  %v1251_v38 = vpack.c.bf16 %v836_v32, %v836_v32  ;;  %v789_v39 = vadd.f32 %v1531_v49, %v750_v33  ;;  %v805_v40 = vadd.f32 %v1531_v49, %v766_v34 }
 0x109   : > { %v631_v41 = vpop.f32.mrf.mxu0  ;;  %v695_v42 = vpop.f32.mrf.mxu1 }
 0x10a   : > { %981 = vst.msk [vmem:[%s1543_s29 + $0xc] sm:$0xf] %vm977_vm3, %v1235_v37  ;;  %997 = vst.msk [vmem:[%s1543_s29 + $0x4c] sm:$0xf] %vm977_vm3, %v1251_v38  ;;  %v821_v43 = vmax.f32 %v789_v39, 0.0  ;;  %v837_v44 = vmax.f32 %v805_v40, 0.0  ;;  %v751_v45 = vmul.f32 %v1526_v47, %v631_v41  ;;  %v767_v46 = vmul.f32 %v1526_v47, %v695_v42 }
 0x10b   : > { %v633_v48 = vpop.f32.mrf.mxu0  ;;  %v697_v50 = vpop.f32.mrf.mxu1 }
 0x10c   : > { %v1236_v51 = vpack.c.bf16 %v821_v43, %v821_v43  ;;  %v1252_v52 = vpack.c.bf16 %v837_v44, %v837_v44  ;;  %v790_v53 = vadd.f32 %v1531_v49, %v751_v45  ;;  %v806_v54 = vadd.f32 %v1531_v49, %v767_v46 }
 0x10d   : > { %v636_v55 = vpop.f32.mrf.mxu0  ;;  %v700_v56 = vpop.f32.mrf.mxu1 }
 0x10e   : > { %982 = vst.msk [vmem:[%s1543_s29 + $0x10] sm:$0xf] %vm977_vm3, %v1236_v51  ;;  %998 = vst.msk [vmem:[%s1543_s29 + $0x50] sm:$0xf] %vm977_vm3, %v1252_v52  ;;  %v822_v57 = vmax.f32 %v790_v53, 0.0  ;;  %v838_v58 = vmax.f32 %v806_v54, 0.0  ;;  %v752_v59 = vmul.f32 %v1526_v47, %v636_v55  ;;  %v768_v60 = vmul.f32 %v1526_v47, %v700_v56 }
 0x10f   : > { %v638_v61 = vpop.f32.mrf.mxu0  ;;  %v702_v62 = vpop.f32.mrf.mxu1 }
 0x110   : > { %v1237_v63 = vpack.c.bf16 %v822_v57, %v822_v57  ;;  %v1253_v0 = vpack.c.bf16 %v838_v58, %v838_v58  ;;  %v791_v1 = vadd.f32 %v1531_v49, %v752_v59  ;;  %v807_v2 = vadd.f32 %v1531_v49, %v768_v60 }
 0x111   : > { %v639_v3 = vpop.f32.mrf.mxu0  ;;  %v703_v4 = vpop.f32.mrf.mxu1 }
 0x112   : > { %983 = vst.msk [vmem:[%s1543_s29 + $0x14] sm:$0xf] %vm977_vm3, %v1237_v63  ;;  %999 = vst.msk [vmem:[%s1543_s29 + $0x54] sm:$0xf] %vm977_vm3, %v1253_v0  ;;  %v823_v5 = vmax.f32 %v791_v1, 0.0  ;;  %v839_v6 = vmax.f32 %v807_v2, 0.0  ;;  %v753_v7 = vmul.f32 %v1526_v47, %v639_v3  ;;  %v769_v8 = vmul.f32 %v1526_v47, %v703_v4 }
 0x113   : > { %v641_v9 = vpop.f32.mrf.mxu0  ;;  %v705_v10 = vpop.f32.mrf.mxu1 }
 0x114   : > { %v1238_v11 = vpack.c.bf16 %v823_v5, %v823_v5  ;;  %v1254_v12 = vpack.c.bf16 %v839_v6, %v839_v6  ;;  %v792_v13 = vadd.f32 %v1531_v49, %v753_v7  ;;  %v808_v14 = vadd.f32 %v1531_v49, %v769_v8 }
 0x115   : > { %v644_v15 = vpop.f32.mrf.mxu0  ;;  %v708_v16 = vpop.f32.mrf.mxu1 }
 0x116   : > { %984 = vst.msk [vmem:[%s1543_s29 + $0x18] sm:$0xf] %vm977_vm3, %v1238_v11  ;;  %1000 = vst.msk [vmem:[%s1543_s29 + $0x58] sm:$0xf] %vm977_vm3, %v1254_v12  ;;  %v824_v17 = vmax.f32 %v792_v13, 0.0  ;;  %v840_v18 = vmax.f32 %v808_v14, 0.0  ;;  %v754_v19 = vmul.f32 %v1526_v47, %v644_v15  ;;  %v770_v20 = vmul.f32 %v1526_v47, %v708_v16 }
 0x117   : > { %v646_v21 = vpop.f32.mrf.mxu0  ;;  %v710_v22 = vpop.f32.mrf.mxu1 }
 0x118   : > { %v1239_v23 = vpack.c.bf16 %v824_v17, %v824_v17  ;;  %v1255_v24 = vpack.c.bf16 %v840_v18, %v840_v18  ;;  %v793_v25 = vadd.f32 %v1531_v49, %v754_v19  ;;  %v809_v26 = vadd.f32 %v1531_v49, %v770_v20 }
 0x119   : > { %v647_v27 = vpop.f32.mrf.mxu0  ;;  %v711_v28 = vpop.f32.mrf.mxu1 }
 0x11a   : > { %985 = vst.msk [vmem:[%s1543_s29 + $0x1c] sm:$0xf] %vm977_vm3, %v1239_v23  ;;  %1001 = vst.msk [vmem:[%s1543_s29 + $0x5c] sm:$0xf] %vm977_vm3, %v1255_v24  ;;  %v825_v29 = vmax.f32 %v793_v25, 0.0  ;;  %v841_v30 = vmax.f32 %v809_v26, 0.0  ;;  %v755_v31 = vmul.f32 %v1526_v47, %v647_v27  ;;  %v771_v32 = vmul.f32 %v1526_v47, %v711_v28 }
 0x11b   : > { %v649_v33 = vpop.f32.mrf.mxu0  ;;  %v713_v34 = vpop.f32.mrf.mxu1 }
 0x11c   : > { %v1240_v35 = vpack.c.bf16 %v825_v29, %v825_v29  ;;  %v1256_v36 = vpack.c.bf16 %v841_v30, %v841_v30  ;;  %v794_v37 = vadd.f32 %v1531_v49, %v755_v31  ;;  %v810_v38 = vadd.f32 %v1531_v49, %v771_v32 }
 0x11d   : > { %v652_v39 = vpop.f32.mrf.mxu0  ;;  %v716_v40 = vpop.f32.mrf.mxu1 }
 0x11e   : > { %986 = vst.msk [vmem:[%s1543_s29 + $0x20] sm:$0xf] %vm977_vm3, %v1240_v35  ;;  %1002 = vst.msk [vmem:[%s1543_s29 + $0x60] sm:$0xf] %vm977_vm3, %v1256_v36  ;;  %v826_v41 = vmax.f32 %v794_v37, 0.0  ;;  %v842_v42 = vmax.f32 %v810_v38, 0.0  ;;  %v756_v43 = vmul.f32 %v1526_v47, %v652_v39  ;;  %v772_v44 = vmul.f32 %v1526_v47, %v716_v40 }
 0x11f   : > { %v654_v45 = vpop.f32.mrf.mxu0  ;;  %v718_v46 = vpop.f32.mrf.mxu1 }
 0x120   : > { %v1241_v48 = vpack.c.bf16 %v826_v41, %v826_v41  ;;  %v1257_v50 = vpack.c.bf16 %v842_v42, %v842_v42  ;;  %v795_v51 = vadd.f32 %v1531_v49, %v756_v43  ;;  %v811_v52 = vadd.f32 %v1531_v49, %v772_v44 }
 0x121   : > { %v655_v53 = vpop.f32.mrf.mxu0  ;;  %v719_v54 = vpop.f32.mrf.mxu1 }
 0x122   : > { %987 = vst.msk [vmem:[%s1543_s29 + $0x24] sm:$0xf] %vm977_vm3, %v1241_v48  ;;  %1003 = vst.msk [vmem:[%s1543_s29 + $0x64] sm:$0xf] %vm977_vm3, %v1257_v50  ;;  %v827_v55 = vmax.f32 %v795_v51, 0.0  ;;  %v843_v56 = vmax.f32 %v811_v52, 0.0  ;;  %v757_v57 = vmul.f32 %v1526_v47, %v655_v53  ;;  %v773_v58 = vmul.f32 %v1526_v47, %v719_v54 }
 0x123   : > { %v657_v59 = vpop.f32.mrf.mxu0  ;;  %v721_v60 = vpop.f32.mrf.mxu1 }
 0x124   : > { %v1242_v61 = vpack.c.bf16 %v827_v55, %v827_v55  ;;  %v1258_v62 = vpack.c.bf16 %v843_v56, %v843_v56  ;;  %v796_v63 = vadd.f32 %v1531_v49, %v757_v57  ;;  %v812_v0 = vadd.f32 %v1531_v49, %v773_v58 }
 0x125   : > { %v660_v1 = vpop.f32.mrf.mxu0  ;;  %v724_v2 = vpop.f32.mrf.mxu1 }
 0x126   : > { %988 = vst.msk [vmem:[%s1543_s29 + $0x28] sm:$0xf] %vm977_vm3, %v1242_v61  ;;  %1004 = vst.msk [vmem:[%s1543_s29 + $0x68] sm:$0xf] %vm977_vm3, %v1258_v62  ;;  %v828_v3 = vmax.f32 %v796_v63, 0.0  ;;  %v844_v4 = vmax.f32 %v812_v0, 0.0  ;;  %v758_v5 = vmul.f32 %v1526_v47, %v660_v1  ;;  %v774_v6 = vmul.f32 %v1526_v47, %v724_v2 }
 0x127   : > { %v662_v7 = vpop.f32.mrf.mxu0  ;;  %v726_v8 = vpop.f32.mrf.mxu1 }
 0x128   : > { %v1243_v9 = vpack.c.bf16 %v828_v3, %v828_v3  ;;  %v1259_v10 = vpack.c.bf16 %v844_v4, %v844_v4  ;;  %v797_v11 = vadd.f32 %v1531_v49, %v758_v5  ;;  %v813_v12 = vadd.f32 %v1531_v49, %v774_v6 }
 0x129   : > { %v663_v13 = vpop.f32.mrf.mxu0  ;;  %v727_v14 = vpop.f32.mrf.mxu1 }
 0x12a   : > { %989 = vst.msk [vmem:[%s1543_s29 + $0x2c] sm:$0xf] %vm977_vm3, %v1243_v9  ;;  %1005 = vst.msk [vmem:[%s1543_s29 + $0x6c] sm:$0xf] %vm977_vm3, %v1259_v10  ;;  %v829_v15 = vmax.f32 %v797_v11, 0.0  ;;  %v845_v16 = vmax.f32 %v813_v12, 0.0  ;;  %v759_v17 = vmul.f32 %v1526_v47, %v663_v13  ;;  %v775_v18 = vmul.f32 %v1526_v47, %v727_v14 }
 0x12b   : > { %v665_v19 = vpop.f32.mrf.mxu0  ;;  %v729_v20 = vpop.f32.mrf.mxu1 }
 0x12c   : > { %v1244_v21 = vpack.c.bf16 %v829_v15, %v829_v15  ;;  %v1260_v22 = vpack.c.bf16 %v845_v16, %v845_v16  ;;  %v798_v23 = vadd.f32 %v1531_v49, %v759_v17  ;;  %v814_v24 = vadd.f32 %v1531_v49, %v775_v18 }
 0x12d   : > { %v668_v25 = vpop.f32.mrf.mxu0  ;;  %v732_v26 = vpop.f32.mrf.mxu1 }
 0x12e   : > { %990 = vst.msk [vmem:[%s1543_s29 + $0x30] sm:$0xf] %vm977_vm3, %v1244_v21  ;;  %1006 = vst.msk [vmem:[%s1543_s29 + $0x70] sm:$0xf] %vm977_vm3, %v1260_v22  ;;  %v830_v27 = vmax.f32 %v798_v23, 0.0  ;;  %v846_v28 = vmax.f32 %v814_v24, 0.0  ;;  %v760_v29 = vmul.f32 %v1526_v47, %v668_v25  ;;  %v776_v30 = vmul.f32 %v1526_v47, %v732_v26 }
 0x12f   : > { %v670_v31 = vpop.f32.mrf.mxu0  ;;  %v734_v32 = vpop.f32.mrf.mxu1 }
 0x130   : > { %v1245_v33 = vpack.c.bf16 %v830_v27, %v830_v27  ;;  %v1261_v34 = vpack.c.bf16 %v846_v28, %v846_v28  ;;  %v799_v35 = vadd.f32 %v1531_v49, %v760_v29  ;;  %v815_v36 = vadd.f32 %v1531_v49, %v776_v30 }
 0x131   : > { %v671_v37 = vpop.f32.mrf.mxu0  ;;  %v735_v38 = vpop.f32.mrf.mxu1 }
 0x132   : > { %991 = vst.msk [vmem:[%s1543_s29 + $0x34] sm:$0xf] %vm977_vm3, %v1245_v33  ;;  %1007 = vst.msk [vmem:[%s1543_s29 + $0x74] sm:$0xf] %vm977_vm3, %v1261_v34  ;;  %v831_v39 = vmax.f32 %v799_v35, 0.0  ;;  %v847_v40 = vmax.f32 %v815_v36, 0.0  ;;  %v761_v41 = vmul.f32 %v1526_v47, %v671_v37  ;;  %v777_v42 = vmul.f32 %v1526_v47, %v735_v38 }
 0x133   : > { %v673_v43 = vpop.f32.mrf.mxu0  ;;  %v737_v44 = vpop.f32.mrf.mxu1 }
 0x134   : > { %v1246_v45 = vpack.c.bf16 %v831_v39, %v831_v39  ;;  %v1262_v46 = vpack.c.bf16 %v847_v40, %v847_v40  ;;  %v800_v48 = vadd.f32 %v1531_v49, %v761_v41  ;;  %v816_v50 = vadd.f32 %v1531_v49, %v777_v42 }
 0x136   : > { %992 = vst.msk [vmem:[%s1543_s29 + $0x38] sm:$0xf] %vm977_vm3, %v1246_v45  ;;  %1008 = vst.msk [vmem:[%s1543_s29 + $0x78] sm:$0xf] %vm977_vm3, %v1262_v46  ;;  %v832_v51 = vmax.f32 %v800_v48, 0.0  ;;  %v848_v52 = vmax.f32 %v816_v50, 0.0 }
 0x138   : > { %v1247_v53 = vpack.c.bf16 %v832_v51, %v832_v51  ;;  %v1263_v54 = vpack.c.bf16 %v848_v52, %v848_v52 }
 0x13a   : > { %993 = vst.msk [vmem:[%s1543_s29 + $0x3c] sm:$0xf] %vm977_vm3, %v1247_v53  ;;  %1009 = vst.msk [vmem:[%s1543_s29 + $0x7c] sm:$0xf] %vm977_vm3, %v1263_v54 }
 0x13b PF: > { %s14_s17 = sadd.s32 1, %s1390_s17   ;;  %s1681_s15 = smov %s1386_s16 }
 0x13c   : > { %p11_p5 = scmp.ge.s32.totalorder %s14_s17, 4   ;;  %s1682_s16 = smov %s1684_s18 }
 0x13e   :  { %13 = sbr.rel (!%p11_p5) target bundleno = 2 (0x2), region = 75 }

</bundles_post_ra>
